<compile_context>
chip_gen: v7x
topology: tpu7x:2x2x1
jax: 0.10.0
libtpu: 0.0.40
codegen_flags: <defaults>
</compile_context>

<pallas_src>
import jax
import jax.numpy as jnp
from jax.experimental import pallas as pl
from jax.experimental.pallas import tpu as pltpu


_VMEM_LIMIT_BYTES = 64 * 1024 * 1024          # raise v5e/v6e default scoped limit
_DEFAULT_BUDGET_BYTES = 32 * 1024 * 1024      # per-step block budget (v7x-safe)


# --------------------------------------------------------------------------
# Fused single-pass kernel: one whole (C, HW) sample per grid step.
# --------------------------------------------------------------------------
def _se_fused_kernel(x_ref, w_ref, b_ref, o_ref):
    # x_ref: (C, HW) input-dtype; w_ref: (C, C) f32; b_ref: (C, 1) f32.
    x = x_ref[...]
    inv_hw = 1.0 / x.shape[1]
    # AdaptiveAvgPool2d(1): lane-axis mean with f32 accumulation (no f32 copy of x).
    pooled = jnp.sum(x, axis=1, keepdims=True, dtype=jnp.float32) * inv_hw   # (C, 1)
    # Conv2d(c, c, 1) on a 1x1 map: W @ pooled + b (W already in dot orientation).
    att = jax.nn.sigmoid(
        jnp.dot(w_ref[...], pooled, preferred_element_type=jnp.float32)
        + b_ref[...])                                                         # (C, 1) f32
    # Broadcast-multiply over lanes; per-element promotion, store in input dtype.
    o_ref[...] = (x * att).astype(o_ref.dtype)


# --------------------------------------------------------------------------
# Two-phase kernels (large samples that do not fit VMEM as a single block).
# --------------------------------------------------------------------------
def _pool_kernel(x_ref, sum_ref):
    # x_ref: (C, hw_t); sum_ref: (C, 1) f32 accumulator, resident across the
    # (last, "arbitrary") HW-tile grid axis.
    h = pl.program_id(1)

    @pl.when(h == 0)
    def _():
        sum_ref[...] = jnp.zeros_like(sum_ref)

    sum_ref[...] += jnp.sum(x_ref[...], axis=1, keepdims=True, dtype=jnp.float32)


def _scale_kernel(x_ref, att_ref, o_ref):
    # x_ref: (C, hw_t) input-dtype; att_ref: (C, 1) f32 gate.
    o_ref[...] = (x_ref[...] * att_ref[...]).astype(o_ref.dtype)


def _pick_hw_tile(hw, c, itemsize, budget_bytes):
    """Largest divisor of HW that is a multiple of 128 and fits the block budget."""
    if hw % 128 != 0:
        return hw  # cannot tile lane-aligned; take full rows
    # cost model: double-buffered input block + double-buffered output block
    best = 128     # TODO(synk): very large C may need channel tiling on top of this
    t = 128
    while t <= hw:
        if hw % t == 0 and 4 * c * t * itemsize <= budget_bytes:
            best = t
        t += 128
    return best


# --------------------------------------------------------------------------
# Wrapper
# --------------------------------------------------------------------------
def se_block(x_nchw, weight, bias, *, force_two_phase=False,
             vmem_budget_bytes=_DEFAULT_BUDGET_BYTES):
    """x_nchw: (N, C, H, W); weight: (C, C) (or (C, C, 1, 1)); bias: (C,)."""
    N, C, H, W = x_nchw.shape
    HW = H * W

    if weight.ndim == 4:
        weight = weight.reshape(weight.shape[0], weight.shape[1])
    w_f32 = weight.astype(jnp.float32)                 # cast once, dot-ready (C_out, C_in)
    b_f32 = bias.astype(jnp.float32).reshape(C, 1)

    # Free reshape (contiguous dims merged) -- no transpose, no extra HBM traffic.
    x3 = x_nchw.reshape(N, C, HW)
    itemsize = jnp.dtype(x3.dtype).itemsize

    # Double-buffered in + out whole-sample blocks plus resident W.
    fused_cost = 4 * C * HW * itemsize + C * C * 4

    if (not force_two_phase) and fused_cost <= vmem_budget_bytes:
        out3 = pl.pallas_call(
            _se_fused_kernel,
            out_shape=jax.ShapeDtypeStruct((N, C, HW), x3.dtype),
            grid_spec=pltpu.PrefetchScalarGridSpec(
                num_scalar_prefetch=0,
                grid=(N,),
                in_specs=[
                    pl.BlockSpec((pl.Squeezed(), C, HW), lambda n: (n, 0, 0)),
                    pl.BlockSpec((C, C), lambda n: (0, 0)),   # constant block: not re-DMA'd
                    pl.BlockSpec((C, 1), lambda n: (0, 0)),
                ],
                out_specs=pl.BlockSpec((pl.Squeezed(), C, HW), lambda n: (n, 0, 0)),
            ),
            compiler_params=pltpu.CompilerParams(
                dimension_semantics=("parallel",),
                vmem_limit_bytes=_VMEM_LIMIT_BYTES),
        )(x3, w_f32, b_f32)
        return out3.reshape(N, C, H, W)

    # ---------------- two-phase path ----------------
    hw_t = _pick_hw_tile(HW, C, itemsize, vmem_budget_bytes)
    n_hw = HW // hw_t

    # Phase A: per-(sample, channel) spatial sums, f32 accumulation in the
    # resident output block (reduction axis last in the grid).
    sums = pl.pallas_call(
        _pool_kernel,
        out_shape=jax.ShapeDtypeStruct((N, C, 1), jnp.float32),
        grid_spec=pltpu.PrefetchScalarGridSpec(
            num_scalar_prefetch=0,
            grid=(N, n_hw),
            in_specs=[pl.BlockSpec((pl.Squeezed(), C, hw_t), lambda n, h: (n, 0, h))],
            out_specs=pl.BlockSpec((pl.Squeezed(), C, 1), lambda n, h: (n, 0, 0)),
        ),
        compiler_params=pltpu.CompilerParams(
            dimension_semantics=("parallel", "arbitrary"),
            vmem_limit_bytes=_VMEM_LIMIT_BYTES),
    )(x3)

    # Gate: batched (N,C)x(C,C) matmul + sigmoid.  Tiny; done once in XLA so
    # all N samples share one matmul instead of one MXU column per grid step.
    pooled = sums[:, :, 0] * (1.0 / HW)                                # (N, C) f32
    att3 = jax.nn.sigmoid(pooled @ w_f32.T + b_f32[:, 0])[:, :, None]  # (N, C, 1) f32

    # Phase B: streaming lane-dense broadcast-multiply, fully parallel grid
    # (extra HW-tile axis lets v7x shard across both TensorCores).
    out3 = pl.pallas_call(
        _scale_kernel,
        out_shape=jax.ShapeDtypeStruct((N, C, HW), x3.dtype),
        grid_spec=pltpu.PrefetchScalarGridSpec(
            num_scalar_prefetch=0,
            grid=(N, n_hw),
            in_specs=[
                pl.BlockSpec((pl.Squeezed(), C, hw_t), lambda n, h: (n, 0, h)),
                pl.BlockSpec((pl.Squeezed(), C, 1), lambda n, h: (n, 0, 0)),
            ],
            out_specs=pl.BlockSpec((pl.Squeezed(), C, hw_t), lambda n, h: (n, 0, h)),
        ),
        compiler_params=pltpu.CompilerParams(
            dimension_semantics=("parallel", "parallel"),
            vmem_limit_bytes=_VMEM_LIMIT_BYTES),
    )(x3, att3)
    return out3.reshape(N, C, H, W)


def se_block_ref(x_nchw, weight, bias):
    """Pure-JAX reference matching the PyTorch semantics."""
    pooled = jnp.mean(x_nchw.astype(jnp.float32), axis=(2, 3))            # (N, C)
    att = pooled @ weight.astype(jnp.float32).T + bias.astype(jnp.float32)
    att = jax.nn.sigmoid(att)[:, :, None, None]                           # (N, C, 1, 1)
    return (x_nchw.astype(jnp.float32) * att).astype(x_nchw.dtype)


if __name__ == "__main__":
    key = jax.random.PRNGKey(0)
    kx, kw, kb = jax.random.split(key, 3)

    # Conv2d(C, C, kernel_size=1): weight (C, C, 1, 1) stored as (C, C); bias (C,).
    N, C, H, W = 2, 4, 16, 16
    x = jax.random.normal(kx, (N, C, H, W), dtype=jnp.float32)
    weight = jax.random.normal(kw, (C, C), dtype=jnp.float32) * 0.1
    bias = jax.random.normal(kb, (C,), dtype=jnp.float32) * 0.1

    # 1) Fused single-pass path.
    out = jax.block_until_ready(se_block(x, weight, bias))
    ref = se_block_ref(x, weight, bias)
    assert out.shape == (N, C, H, W)
    assert jnp.allclose(out, ref, atol=1e-5, rtol=1e-5), "fused path mismatch"

    # 2) Two-phase tiled path (forced via a tiny block budget so HW gets tiled).
    N2, C2, H2, W2 = 2, 8, 32, 32
    x2 = jax.random.normal(kx, (N2, C2, H2, W2), dtype=jnp.float32)
    w2 = jax.random.normal(kw, (C2, C2), dtype=jnp.float32) * 0.1
    b2 = jax.random.normal(kb, (C2,), dtype=jnp.float32) * 0.1
    out2 = jax.block_until_ready(
        se_block(x2, w2, b2, force_two_phase=True, vmem_budget_bytes=40_000))
    ref2 = se_block_ref(x2, w2, b2)
    assert jnp.allclose(out2, ref2, atol=1e-5, rtol=1e-5), "two-phase path mismatch"

    # 3) bf16 input (no full-tile f32 materialization; gate stays f32).
    xb = x.astype(jnp.bfloat16)
    outb = jax.block_until_ready(se_block(xb, weight, bias))
    refb = se_block_ref(xb, weight, bias)
    assert jnp.allclose(outb.astype(jnp.float32), refb.astype(jnp.float32),
                        atol=2e-2, rtol=2e-2), "bf16 path mismatch"

    print("KERNEL_OK")
</pallas_src>

<mosaic_0001>
module attributes {stable_mosaic.version = 11 : i64} {
  func.func @_se_fused_kernel(%arg0: i32, %arg1: memref<1x4x256xf32, #tpu.memory_space<vmem>>, %arg2: memref<4x4xf32, #tpu.memory_space<vmem>>, %arg3: memref<4x1xf32, #tpu.memory_space<vmem>>, %arg4: memref<1x4x256xf32, #tpu.memory_space<vmem>>) attributes {dimension_semantics = [#tpu.dimension_semantics<parallel>], iteration_bounds = array<i64: 2>, scalar_prefetch = 0 : i64, scratch_operands = 0 : i64, tpu.core_type = #tpu.core_type<tc>, window_params = [{transform_indices = @transform_0, window_bounds = array<i64: 1, 4, 256>}, {pipeline_mode = #tpu.pipeline_mode<synchronous>, transform_indices = @transform_1, window_bounds = array<i64: 4, 4>}, {pipeline_mode = #tpu.pipeline_mode<synchronous>, transform_indices = @transform_2, window_bounds = array<i64: 4, 1>}, {transform_indices = @transform_3, window_bounds = array<i64: 1, 4, 256>}]} {
    %c0 = arith.constant 0 : index
    %c0_0 = arith.constant 0 : index
    %c0_1 = arith.constant 0 : index
    %0 = vector.load %arg1[%c0, %c0_0, %c0_1] : memref<1x4x256xf32, #tpu.memory_space<vmem>>, vector<1x4x256xf32>
    %1 = vector.shape_cast %0 : vector<1x4x256xf32> to vector<4x256xf32>
    %cst = arith.constant dense<0.000000e+00> : vector<4xf32>
    %2 = vector.multi_reduction <add>, %1, %cst [1] : vector<4x256xf32> to vector<4xf32>
    %3 = vector.shape_cast %2 : vector<4xf32> to vector<4x1xf32>
    %cst_2 = arith.constant 3.906250e-03 : f32
    %4 = vector.broadcast %cst_2 : f32 to vector<4x1xf32>
    %5 = arith.mulf %3, %4 : vector<4x1xf32>
    %c0_3 = arith.constant 0 : index
    %c0_4 = arith.constant 0 : index
    %6 = vector.load %arg2[%c0_3, %c0_4] : memref<4x4xf32, #tpu.memory_space<vmem>>, vector<4x4xf32>
    %cst_5 = arith.constant dense<0.000000e+00> : vector<4x1xf32>
    %7 = tpu.matmul %6, %5, %cst_5 {dimension_numbers = #tpu.dot_dimension_numbers<[1], [0], [0], [1], [0, 0, 1, 1], [], []>} : vector<4x4xf32>, vector<4x1xf32>, vector<4x1xf32> -> vector<4x1xf32>
    %c0_6 = arith.constant 0 : index
    %c0_7 = arith.constant 0 : index
    %8 = vector.load %arg3[%c0_6, %c0_7] : memref<4x1xf32, #tpu.memory_space<vmem>>, vector<4x1xf32>
    %9 = arith.addf %7, %8 : vector<4x1xf32>
    %10 = arith.negf %9 : vector<4x1xf32>
    %11 = math.exp %10 : vector<4x1xf32>
    %cst_8 = arith.constant 1.000000e+00 : f32
    %12 = vector.broadcast %cst_8 : f32 to vector<4x1xf32>
    %13 = arith.addf %12, %11 : vector<4x1xf32>
    %14 = arith.divf %12, %13 : vector<4x1xf32>
    %15 = vector.broadcast %14 : vector<4x1xf32> to vector<4x256xf32>
    %16 = arith.mulf %1, %15 : vector<4x256xf32>
    %c0_9 = arith.constant 0 : index
    %c0_10 = arith.constant 0 : index
    %c0_11 = arith.constant 0 : index
    %17 = vector.load %arg4[%c0_9, %c0_10, %c0_11] : memref<1x4x256xf32, #tpu.memory_space<vmem>>, vector<1x4x256xf32>
    %18 = vector.shape_cast %17 : vector<1x4x256xf32> to vector<4x256xf32>
    %19 = vector.shape_cast %16 : vector<4x256xf32> to vector<1x4x256xf32>
    tpu.vector_store %arg4[%c0_9, %c0_10, %c0_11], %19 {strides = array<i32>} : memref<1x4x256xf32, #tpu.memory_space<vmem>>, vector<1x4x256xf32>,
    return
  }
  func.func @transform_0(%arg0: i32) -> (i32, i32, i32) {
    %c0_i32 = arith.constant 0 : i32
    %c0_i32_0 = arith.constant 0 : i32
    %c0_i32_1 = arith.constant 0 : i32
    return %arg0, %c0_i32, %c0_i32_0 : i32, i32, i32
  }
  func.func @transform_1(%arg0: i32) -> (i32, i32) {
    %c0_i32 = arith.constant 0 : i32
    %c0_i32_0 = arith.constant 0 : i32
    %c0_i32_1 = arith.constant 0 : i32
    return %c0_i32, %c0_i32_0 : i32, i32
  }
  func.func @transform_2(%arg0: i32) -> (i32, i32) {
    %c0_i32 = arith.constant 0 : i32
    %c0_i32_0 = arith.constant 0 : i32
    %c0_i32_1 = arith.constant 0 : i32
    return %c0_i32, %c0_i32_0 : i32, i32
  }
  func.func @transform_3(%arg0: i32) -> (i32, i32, i32) {
    %c0_i32 = arith.constant 0 : i32
    %c0_i32_0 = arith.constant 0 : i32
    %c0_i32_1 = arith.constant 0 : i32
    return %arg0, %c0_i32, %c0_i32_0 : i32, i32, i32
  }
}

</mosaic_0001>

<bundles_post_ra>
// kernel: tpu_custom_call.1
= control target key start
LH: loop header
LB: loop body
LE: loop exit
PB: predicated region body
PF: predicated region fallthrough
CT: control target
= control target key end

     0   :  { %8 = vsyncpa [#allocation3], 0  ;;  %s948_s0 = inlined_call_operand.hbm [shape: f32[2,4,256], index: 0, kind: input, shape index: {}]   ;;  %s949_s1 = inlined_call_operand.hbm [shape: f32[4,4], index: 1, kind: input, shape index: {}]   ;;  %s950_s2 = inlined_call_operand.hbm [shape: f32[4,1], index: 2, kind: input, shape index: {}]   ;;  %s951_s3 = inlined_call_operand.hbm [shape: f32[2,4,256], index: 3, kind: output, shape index: {}]  }
   0x1   :  { %10 = vsyncpa [#allocation3 + $0x1], 0 }
   0x2   :  { %11 = vsyncpa [#allocation6], 0 }
   0x3   :  { %12 = vsyncpa [#allocation4], 0 }
   0x4   :  { %14 = vsyncpa [#allocation4 + $0x1], 0  ;;  %s719_s12 = smov 0   ;;  %s721_s13 = smov 0  }
   0x5   :  { %s723_s14 = smov 0   ;;  %s725_s15 = smov 0  }
   0x6 LB: > { %s740_s16 = sadd.s32 4294967295, %s689_s15   ;;  %s426_s17 = sadd.s32 4294967294, %s689_s15   ;;  %s689_s15 = sphi %s725_s15, %s971_s15   ;;  %s685_s14 = sphi %s723_s14, %s970_s14   ;;  %s681_s13 = sphi %s721_s13, %s969_s13   ;;  %s677_s12 = sphi %s719_s12, %s968_s12  }
   0x7   : > { %p40_p0 = scmp.ne.s32.totalorder %s681_s13, %s677_s12  ;;  %p952_p1 = scmp.eq.s32.totalorder %s740_s16, 0 }
   0x8   : > { %p112_p3 = scmp.eq.s32.totalorder %s426_s17, 1  ;;  %p427_p5 = scmp.ge.s32.totalorder %s689_s15, 1 }
   0x9   : > { %p749_p4 = por %p952_p1, %p40_p0  ;;  %p119_p7 = scmp.lt.s32.totalorder %s689_s15, 3 }
   0xa   : > { %p754_p6 = por %p112_p3, %p40_p0  ;;  %s691_s21 = smov [#allocation5]  }
   0xb   : > { %s955_s18 = scalar_select %p749_p4, 1, 0 }
   0xc   : > { %s956_s19 = scalar_select %p754_p6, 1, 0 }
   0xd   : > { %p759_p8 = pnand %p427_p5, %p119_p7  ;;  %s132_s22 = sshll.u32 %s691_s21, 4  ;;  %s133_s22 = int_to_ptr.vmem [resolvable:$true] %s132_s22 }
   0xe   : > { %s692_s23 = smov [#allocation7]   ;;  %s775_s26 = sadd.s32 1, %s689_s15  }
   0xf   : > { %s957_s20 = scalar_select %p759_p8, 1, 0 }
  0x10   : > { %p468_p10 = pneg %p759_p8  ;;  %s143_s24 = sshll.u32 %s692_s23, 4  ;;  %s772_s24 = int_to_ptr.vmem [resolvable:$true] %s143_s24 }
  0x11   : > { %s24_s27 = ssub.s32 %s689_s15, %s775_s26  ;;  %s533_s30 = scalar_lea.hbm %s949_s1, 64 }
  0x12   : > { %p768_p11 = pnand %p468_p10, %p952_p1  ;;  %p534_p12 = scmp.ne.s32.totalorder %s949_s1, %s533_s30 }
  0x13   : > { %p540_p5 = scmp.lt.u32.totalorder %s533_s30, %s949_s1 }
  0x14   : > { %p535_p13 = pneg %p768_p11 }
  0x16   : > { %p536_p0 = pnand %p535_p13, %p534_p12 }
  0x18   : > { %p537_p3 = pneg %p536_p0 }
  0x1a   : > { %p542_p7 = pnand %p540_p5, %p537_p3 }
  0x1c   : > { %545 = shalt.err (!%p542_p7)
}
  0x1d   : > { %s546_s8 = scalar_lea.vmem %s133_s22, 64  ;;  %p554_p2 = scmp.lt.s32.totalorder %s133_s22, %s133_s22 }
  0x1e   : > { %p547_p10 = scmp.ne.s32.totalorder %s133_s22, %s546_s8  ;;  %p555_p6 = scmp.lt.s32.totalorder %s546_s8, %s546_s8 }
  0x20   : > { %p549_p9 = pnand %p547_p10, %p535_p13  ;;  %p556_p4 = por %p555_p6, %p554_p2 }
  0x22   : > { %p550_p1 = pneg %p549_p9 }
  0x24   : > { %p557_p8 = pnand %p556_p4, %p550_p1 }
  0x26   : > { %560 = shalt.err (!%p557_p8)
}
  0x27   : > { %471 = dma.hbm_to_vmem [thread:$0]  (!%p768_p11), %s949_s1, 64, %s133_s22, [#allocation6]  }
  0x28   : > { %s561_s21 = scalar_lea.hbm %s950_s2, 64 }
  0x29   : > { %p562_p9 = scmp.ne.s32.totalorder %s950_s2, %s561_s21  ;;  %p568_p4 = scmp.lt.u32.totalorder %s561_s21, %s950_s2 }
  0x2b   : > { %p564_p2 = pnand %p562_p9, %p535_p13 }
  0x2d   : > { %p565_p1 = pneg %p564_p2 }
  0x2f   : > { %p570_p6 = pnand %p568_p4, %p565_p1 }
  0x31   : > { %573 = shalt.err (!%p570_p6)
}
  0x32   : > { %s574_s22 = scalar_lea.vmem %s772_s24, 64  ;;  %p582_p3 = scmp.lt.s32.totalorder %s772_s24, %s772_s24 }
  0x33   : > { %p575_p8 = scmp.ne.s32.totalorder %s772_s24, %s574_s22  ;;  %p583_p5 = scmp.lt.s32.totalorder %s574_s22, %s574_s22 }
  0x35   : > { %p577_p12 = pnand %p575_p8, %p535_p13  ;;  %p584_p7 = por %p583_p5, %p582_p3 }
  0x37   : > { %p578_p0 = pneg %p577_p12 }
  0x39   : > { %p585_p10 = pnand %p584_p7, %p578_p0 }
  0x3b   : > { %588 = shalt.err (!%p585_p10)
}
  0x3c   : > { %474 = dma.hbm_to_vmem [thread:$0]  (!%p768_p11), %s950_s2, 64, %s772_s24, [#allocation6]  }
  0x3d   : > { %p25_p13 = scmp.eq.s32.totalorder %s24_s27, 0  ;;  %s27_s6 = sadd.s32 1, %s685_s14 }
  0x3e   : > { %p34_p9 = scmp.ne.s32.totalorder %s685_s14, %s681_s13  ;;  %p35_p2 = scmp.eq.s32.totalorder %s689_s15, 0 }
  0x3f   : > { %s834_s25 = scalar_select %p25_p13, %s685_s14, %s27_s6  }
  0x40   : > { %p36_p1 = por %p35_p2, %p34_p9  ;;  %p959_p4 = scmp.eq.s32.totalorder %s740_s16, 1 }
  0x41   : > { %p485_p8 = scmp.lt.s32.totalorder %s689_s15, 2  ;;  %s154_s8 = sand.u32 1, %s685_s14  }
  0x42   : > { %p838_p6 = por %p959_p4, %p34_p9  ;;  %s431_s9 = sshll.u32 %s154_s8, 3 }
  0x43   : > { %s447_s10 = sshll.u32 %s689_s15, 7  ;;  %s158_s27 = scalar_lea.vmem [#allocation2], %s431_s9 }
  0x44   : > { %s848_s24 = scalar_lea.hbm %s948_s0, %s447_s10  ;;  %s166_s21 = sshll.u32 %s158_s27, 4  ;;  %s850_s21 = int_to_ptr.vmem [resolvable:$true] %s166_s21 }
  0x45   : > { %p852_p11 = pnand %p485_p8, %p36_p1  ;;  %s155_s28 = scalar_lea.sflag [#allocation3], %s154_s8 }
  0x46   : > { %s589_s29 = scalar_lea.hbm %s848_s24, 128  ;;  %s594_s4 = scalar_lea.hbm %s948_s0, 256 }
  0x47   : > { %p590_p12 = scmp.ne.s32.totalorder %s848_s24, %s589_s29  ;;  %p591_p0 = pneg %p852_p11 }
  0x48   : > { %p595_p7 = scmp.lt.u32.totalorder %s848_s24, %s948_s0  ;;  %p596_p10 = scmp.lt.u32.totalorder %s594_s4, %s589_s29 }
  0x49   : > { %p592_p3 = pnand %p591_p0, %p590_p12  ;;  %p598_p9 = scmp.lt.u32.totalorder %s589_s29, %s848_s24 }
  0x4a   : > { %p597_p13 = por %p596_p10, %p595_p7 }
  0x4b   : > { %p593_p5 = pneg %p592_p3 }
  0x4c   : > { %p599_p2 = por %p598_p9, %p597_p13 }
  0x4e   : > { %p600_p1 = pnand %p599_p2, %p593_p5 }
  0x50   : > { %603 = shalt.err (!%p600_p1)
}
  0x51   : > { %s604_s8 = scalar_lea.vmem %s850_s21, 128  ;;  %s693_s9 = smov [#allocation2]  }
  0x52   : > { %p605_p4 = scmp.ne.s32.totalorder %s850_s21, %s604_s8  ;;  %s609_s10 = sshll.u32 %s693_s9, 4  ;;  %s610_s10 = int_to_ptr.vmem [resolvable:$false] %s609_s10 }
  0x53   : > { %s611_s11 = scalar_lea.vmem %s610_s10, 256  ;;  %p612_p3 = scmp.lt.s32.totalorder %s850_s21, %s610_s10 }
  0x54   : > { %p607_p8 = pnand %p605_p4, %p591_p0  ;;  %p613_p7 = scmp.lt.s32.totalorder %s611_s11, %s604_s8 }
  0x56   : > { %p608_p12 = pneg %p607_p8  ;;  %p614_p10 = por %p613_p7, %p612_p3 }
  0x58   : > { %p615_p13 = pnand %p614_p10, %p608_p12 }
  0x5a   : > { %618 = shalt.err (!%p615_p13)
}
  0x5b   : > { %478 = dma.hbm_to_vmem [thread:$0]  (!%p852_p11), %s848_s24, 128, %s850_s21, %s155_s28  }
  0x5c   : > { %p962_p5 = scmp.ne.s32.totalorder %s957_s20, 0 }
  0x5d   : > { %s884_s17 = sand.u32 (!%p962_p5), 1, %s681_s13   ;;  %p963_p0 = scmp.ne.s32.totalorder (!%p962_p5), %s955_s18, 0 }
  0x5e   : > { %175 = sbr.rel (%p962_p5) target bundleno = 642 (0x282), region = 32  ;;  %s435_s27 = sshll.u32 (!%p962_p5), %s884_s17, 3 }
  0x5f   : > { %s178_s29 = scalar_lea.sflag (!%p962_p5), [#allocation3], %s884_s17  ;;  %s181_s30 = scalar_lea.vmem (!%p962_p5), [#allocation2], %s435_s27 }
  0x65   : > { %664 = dma.done.wait (%p963_p0), %s178_s29, 128  }
  0x66   : > { %666 = vsyncadd (%p963_p0), %s178_s29, 4294967168  ;;  %p964_p11 = scmp.eq.s32.totalorder %s740_s16, 0 }
  0x68   : > { %668 = dma.done.wait (%p964_p11), [#allocation6], 128   ;;  %p965_p9 = pmov %p964_p11 }
  0x69   : > { %vm216_vm0 = vcmask 1043456   ;;  %v212_v0 = vld [vmem:[%s181_s30] sm:$0xff]  ;;  %v694_v5 = vmov 0.0   ;;  %vm695_vm1 = vmmov 0   ;;  %v223_v8 = vld [vmem:[#allocation5] sm:$0xf]  ;;  %v315_v20 = vlaneseq }
  0x6a   : > { %670 = vsyncadd (%p965_p9), [#allocation6], 4294967168  ;;  %v214_v1 = vcombine.high %v212_v0, %v212_v0  ;;  %v217_v2 = vsel %vm216_vm0, %v212_v0, 0.0  ;;  %451 = vmatprep.subr.mxu0 %v694_v5  ;;  %453 = vmatprep.mubr.msk.f32.mxu0 %vm695_vm1, %v694_v5  ;;  %vm225_vm2 = vcmask 31744   ;;  %v696_v9 = vmov 0   ;;  %s448_s18 = sshll.u32 %s740_s16, 7 }
  0x6b   : > { %527 = vset.pattern.permute.xlu0 %v696_v9  ;;  %v224_v10 = vld [vmem:[#allocation7] sm:$0xf]  ;;  %v697_v18 = vmov 839922192   ;;  %v316_v22 = vshrl.u32 %v315_v20, 7  ;;  %s211_s20 = scalar_lea.vmem [#allocation8], %s435_s27  ;;  %s904_s28 = scalar_lea.hbm %s951_s3, %s448_s18 }
  0x6c   : > { %v218_v3 = vsel %vm216_vm0, %v214_v1, 0.0  ;;  %v313_v19 = vunpack.c.l.s4 %v697_v18  ;;  %s337_s24 = sshll.u32 %s211_s20, 4  ;;  %s323_s22 = scalar_lea.sflag [#allocation4], %s884_s17  ;;  %s906_s24 = int_to_ptr.vmem [resolvable:$true] %s337_s24 }
  0x6d   : > { %v219_v4 = vadd.f32 %v218_v3, %v217_v2  ;;  %s619_s4 = scalar_lea.vmem %s906_s24, 128  ;;  %s698_s16 = smov [#allocation8]  }
  0x6e   : > { %v314_v21 = vunpack.c.0.s8 %v313_v19  ;;  %p620_p2 = scmp.ne.s32.totalorder %s906_s24, %s619_s4  ;;  %s623_s5 = sshll.u32 %s698_s16, 4  ;;  %s624_s5 = int_to_ptr.vmem [resolvable:$false] %s623_s5 }
  0x6f   : > { %220 = vadd.xlane.f32.xlu0 %v219_v4  ;;  %s625_s6 = scalar_lea.vmem %s624_s5, 256  ;;  %p626_p8 = scmp.lt.s32.totalorder %s906_s24, %s624_s5 }
  0x70   : > { %v317_v23 = vsub.s32 %v314_v21, %v316_v22  ;;  %p621_p1 = pnand %p620_p2, %p838_p6  ;;  %p627_p12 = scmp.lt.s32.totalorder %s625_s6, %s619_s4 }
  0x72   : > { %p622_p4 = pneg %p621_p1  ;;  %p628_p3 = por %p627_p12, %p626_p8 }
  0x74   : > { %p629_p7 = pnand %p628_p3, %p622_p4 }
  0xfc   : > { %v221_v6 = vpop.xlane.xlu0 %220 }
  0xfd   : > { %v222_v7 = vmul.f32 0.00390625, %v221_v6 }
  0xff   : > { %452 = vmatpush3.msk.msra.mxu0 %vm216_vm0, %v222_v7 }
 0x100   : > { %454 = vmatmul.mubr.msk.f32.vlgmr.msra.gmra.mrb[0].mxu0 %vm225_vm2, %v223_v8 }
 0x1d3   : > { %v298_v11 = vpop.f32.mrb[0].mxu0 }
 0x1d4   : > { %v299_v12 = vadd.f32 %v298_v11, %v224_v10  ;;  %v455_v13 = vpop.f32.mrb[1].mxu0 }
 0x1d6   : > { %v441_v14 = vmul.f32 -1.442695, %v299_v12 }
 0x1d8   : > { %529 = vpow2.f32 %v441_v14 }
 0x1e2   : > { %v530_v15 = vpop.eup %529 }
 0x1e3   : > { %v305_v16 = vadd.f32 1.0, %v530_v15 }
 0x1e5   : > { %531 = vrcp.f32 %v305_v16 }
 0x1ef   : > { %v532_v17 = vpop.eup %531 }
 0x1f0   : > { %310 = vperm.xlu0 %527, %v532_v17  }
 0x26f   : > { %v311_v24 = vpop.permute.xlu0 %310 }
 0x270   : > { %v318_v25 = vrot.slane %v311_v24, %v317_v23 }
 0x272   : > { %v320_v26 = vmul.f32 %v318_v25, %v212_v0 }
 0x274   : > { %321 = vst [vmem:[%s211_s20] sm:$0xff] %v320_v26 }
 0x275   : > { %632 = shalt.err (!%p629_p7)
}
 0x276   : > { %s633_s8 = scalar_lea.hbm %s904_s28, 128  ;;  %s637_s11 = scalar_lea.hbm %s951_s3, 256 }
 0x277   : > { %p634_p10 = scmp.ne.s32.totalorder %s904_s28, %s633_s8  ;;  %p638_p0 = scmp.lt.u32.totalorder %s904_s28, %s951_s3 }
 0x278   : > { %p639_p11 = scmp.lt.u32.totalorder %s637_s11, %s633_s8  ;;  %p641_p2 = scmp.lt.u32.totalorder %s633_s8, %s904_s28 }
 0x279   : > { %p635_p13 = pnand %p634_p10, %p838_p6 }
 0x27a   : > { %p640_p9 = por %p639_p11, %p638_p0 }
 0x27b   : > { %p636_p5 = pneg %p635_p13 }
 0x27c   : > { %p642_p1 = por %p641_p2, %p640_p9 }
 0x27e   : > { %p643_p4 = pnand %p642_p1, %p636_p5 }
 0x280   : > { %646 = shalt.err (!%p643_p4)
}
 0x281   : > { %466 = dma.vmem_to_hbm [thread:$0]  (%p838_p6), %s906_s24, 128, %s904_s28, %s323_s22  }
 0x282 PF: > { %s349_s29 = sand.u32 1, %s677_s12   ;;  %p966_p8 = scmp.ne.s32.totalorder %s956_s19, 0 }
 0x283   : > { %p967_p12 = scmp.ge.s32.totalorder %s689_s15, 2  ;;  %s350_s30 = scalar_lea.sflag [#allocation4], %s349_s29 }
 0x285   : > { %p480_p3 = pnand %p967_p12, %p966_p8 }
 0x287   : > { %672 = dma.done.wait (!%p480_p3), %s350_s30, 128  }
 0x288   : > { %674 = vsyncadd (!%p480_p3), %s350_s30, 4294967168  ;;  %p17_p7 = scmp.ge.s32.totalorder %s775_s26, 4   ;;  %s968_s12 = smov %s681_s13 }
 0x289   : > { %s969_s13 = smov %s685_s14  ;;  %s970_s14 = smov %s834_s25 }
 0x28a   : > { %s971_s15 = smov %s775_s26  ;;  %19 = sbr.rel (!%p17_p7) target bundleno = 6 (0x6), region = 85 }
 0x291   :  { %355 = vsyncpa [#allocation3], 1 }
 0x292   :  { %357 = vsyncpa [#allocation3 + $0x1], 1 }
 0x293   :  { %358 = vsyncpa [#allocation6], 1 }
 0x294   :  { %359 = vsyncpa [#allocation4], 1 }
 0x295   :  { %361 = vsyncpa [#allocation4 + $0x1], 1 }

</bundles_post_ra>
